<compile_context>
chip_gen: v7x
topology: tpu7x:2x2x1
jax: 0.10.0
libtpu: 0.0.40
codegen_flags: <defaults>
</compile_context>

<pallas_src>
import jax
import jax.numpy as jnp
from jax.experimental import pallas as pl
from jax.experimental.pallas import tpu as pltpu  # noqa: F401 (TPU backend)


def _lstm_head_kernel(x_ref, w_ih_t_ref, w_hh_t_ref, b_ref, w_out_t_ref,
                      b_out_ref, out_ref, hn_ref, cn_ref):
    # x_ref is time-major flattened: (T*B, I), rows [t*B:(t+1)*B] = step t.
    TB = x_ref.shape[0]
    H = w_hh_t_ref.shape[0]
    B = hn_ref.shape[0]
    T = TB // B

    # Prologue: hoisted input projection + fused bias, one matmul for all T.
    # Gate column order is [i, f, o, g] (pre-permuted on the host).
    x_proj = (jnp.dot(x_ref[...], w_ih_t_ref[...],
                      preferred_element_type=jnp.float32)
              + b_ref[...])                                  # (T*B, 4H)

    w_hh_t = w_hh_t_ref[...]                                 # (H, 4H) resident

    h = jnp.zeros((B, H), dtype=jnp.float32)
    c = jnp.zeros((B, H), dtype=jnp.float32)

    # Fully-unrolled time recurrence; h/c live in vregs across iterations.
    # TODO(synk): for very long sequences switch to lax.fori_loop over a VMEM
    # scratch copy of x_proj to bound code size / live ranges.
    for t in range(T):
        gates = x_proj[t * B:(t + 1) * B, :] + jnp.dot(
            h, w_hh_t, preferred_element_type=jnp.float32)   # (B, 4H)
        # Sigmoid on the contiguous [i|f|o] block, tanh on [g]: 4H EUP lanes
        # per step instead of 8H.
        ifo = jax.nn.sigmoid(gates[:, 0:3 * H])
        g_g = jnp.tanh(gates[:, 3 * H:4 * H])
        i_g = ifo[:, 0 * H:1 * H]
        f_g = ifo[:, 1 * H:2 * H]
        o_g = ifo[:, 2 * H:3 * H]
        c = f_g * c + i_g * g_g
        h = o_g * jnp.tanh(c)

    hn_ref[...] = h
    cn_ref[...] = c
    z = jnp.tanh(h)                                          # tanh(h_n.view(-1,H))
    out_ref[...] = (jnp.dot(z, w_out_t_ref[...],
                            preferred_element_type=jnp.float32)
                    + b_out_ref[...])


def net_forward(x, kparams):
    """x: (B, T, I) float32; kparams from prepare_params().

    Returns (out, (h_n, c_n)) matching Net.forward(x, None)."""
    w_ih_t, w_hh_t, b, w_out_t, b_out = kparams
    B, T, I = x.shape
    H = w_hh_t.shape[0]
    C = w_out_t.shape[1]

    # Layout prep outside the kernel: time-major (T*B, I) so each time step is
    # a contiguous row block of the hoisted projection.
    x_flat = jnp.transpose(x, (1, 0, 2)).reshape(T * B, I)

    out, h_n, c_n = pl.pallas_call(
        _lstm_head_kernel,
        out_shape=(
            jax.ShapeDtypeStruct((B, C), jnp.float32),
            jax.ShapeDtypeStruct((B, H), jnp.float32),
            jax.ShapeDtypeStruct((B, H), jnp.float32),
        ),
    )(x_flat, w_ih_t, w_hh_t, b, w_out_t, b_out)

    # PyTorch h_n / c_n are (num_layers=1, B, H).
    return out, (h_n[None], c_n[None])


def init_params(key, input_size, hidden_size, num_classes):
    """PyTorch-layout params, uniform(-1/sqrt(H), 1/sqrt(H)) like nn.LSTM/Linear."""
    k = 1.0 / jnp.sqrt(jnp.float32(hidden_size))
    keys = jax.random.split(key, 6)
    u = lambda kk, shape: jax.random.uniform(kk, shape, jnp.float32, -k, k)
    w_ih = u(keys[0], (4 * hidden_size, input_size))    # gate rows: [i, f, g, o]
    w_hh = u(keys[1], (4 * hidden_size, hidden_size))
    b_ih = u(keys[2], (4 * hidden_size,))
    b_hh = u(keys[3], (4 * hidden_size,))
    w_out = u(keys[4], (num_classes, hidden_size))
    b_out = u(keys[5], (num_classes,))
    return (w_ih, w_hh, b_ih, b_hh, w_out, b_out)


def prepare_params(params):
    """One-time host-side transform: transpose weights, fuse biases, and
    permute gate columns [i, f, g, o] -> [i, f, o, g]."""
    w_ih, w_hh, b_ih, b_hh, w_out, b_out = params
    H = w_hh.shape[1]

    def reorder(m_t):  # m_t: (..., 4H) columns in PyTorch order [i, f, g, o]
        return jnp.concatenate(
            [m_t[..., 0:2 * H], m_t[..., 3 * H:4 * H], m_t[..., 2 * H:3 * H]],
            axis=-1)

    w_ih_t = reorder(jnp.asarray(w_ih).T)                          # (I, 4H)
    w_hh_t = reorder(jnp.asarray(w_hh).T)                          # (H, 4H)
    b = reorder((jnp.asarray(b_ih) + jnp.asarray(b_hh)).reshape(1, -1))  # (1, 4H)
    w_out_t = jnp.asarray(w_out).T                                 # (H, C)
    b_out2 = jnp.asarray(b_out).reshape(1, -1)                     # (1, C)
    return (w_ih_t, w_hh_t, b, w_out_t, b_out2)


def net_forward_ref(x, params):
    """Pure-JAX reference in original PyTorch gate order (correctness check)."""
    w_ih, w_hh, b_ih, b_hh, w_out, b_out = params
    B, T, _ = x.shape
    H = w_hh.shape[1]
    h = jnp.zeros((B, H), jnp.float32)
    c = jnp.zeros((B, H), jnp.float32)
    for t in range(T):
        gates = x[:, t, :] @ w_ih.T + h @ w_hh.T + b_ih + b_hh
        i_g = jax.nn.sigmoid(gates[:, 0 * H:1 * H])
        f_g = jax.nn.sigmoid(gates[:, 1 * H:2 * H])
        g_g = jnp.tanh(gates[:, 2 * H:3 * H])
        o_g = jax.nn.sigmoid(gates[:, 3 * H:4 * H])
        c = f_g * c + i_g * g_g
        h = o_g * jnp.tanh(c)
    out = jnp.tanh(h) @ w_out.T + b_out
    return out, (h[None], c[None])


if __name__ == "__main__":
    # Small shapes consistent with the module: Net(num_classes=16, input_size=8,
    # hidden_size=32, num_layers=1, device='cpu', batch_size=2), seq len 8.
    B, T, I, H, C = 2, 8, 8, 32, 16

    key = jax.random.PRNGKey(0)
    k_x, k_p = jax.random.split(key)
    x = jax.random.normal(k_x, (B, T, I), dtype=jnp.float32)
    params = init_params(k_p, I, H, C)
    kparams = prepare_params(params)

    out, (h_n, c_n) = jax.jit(net_forward)(x, kparams)
    jax.block_until_ready((out, h_n, c_n))

    assert out.shape == (B, C)
    assert h_n.shape == (1, B, H) and c_n.shape == (1, B, H)
    assert bool(jnp.all(jnp.isfinite(out)))

    # Correctness vs pure-JAX reference (loose tol: MXU f32 default precision).
    out_r, (h_r, c_r) = net_forward_ref(x, params)
    assert bool(jnp.allclose(out, out_r, atol=2e-2, rtol=2e-2))
    assert bool(jnp.allclose(h_n, h_r, atol=2e-2, rtol=2e-2))
    assert bool(jnp.allclose(c_n, c_r, atol=2e-2, rtol=2e-2))

    print("KERNEL_OK")
</pallas_src>

<mosaic_0001>
module attributes {stable_mosaic.version = 11 : i64} {
  func.func @_lstm_head_kernel(%arg0: memref<16x8xf32, #tpu.memory_space<vmem>>, %arg1: memref<8x128xf32, #tpu.memory_space<vmem>>, %arg2: memref<32x128xf32, #tpu.memory_space<vmem>>, %arg3: memref<1x128xf32, #tpu.memory_space<vmem>>, %arg4: memref<32x16xf32, #tpu.memory_space<vmem>>, %arg5: memref<1x16xf32, #tpu.memory_space<vmem>>, %arg6: memref<2x16xf32, #tpu.memory_space<vmem>>, %arg7: memref<2x32xf32, #tpu.memory_space<vmem>>, %arg8: memref<2x32xf32, #tpu.memory_space<vmem>>) attributes {dimension_semantics = [], scalar_prefetch = 0 : i64, scratch_operands = 0 : i64, tpu.core_type = #tpu.core_type<tc>} {
    %c0 = arith.constant 0 : index
    %c0_0 = arith.constant 0 : index
    %0 = vector.load %arg0[%c0, %c0_0] : memref<16x8xf32, #tpu.memory_space<vmem>>, vector<16x8xf32>
    %c0_1 = arith.constant 0 : index
    %c0_2 = arith.constant 0 : index
    %1 = vector.load %arg1[%c0_1, %c0_2] : memref<8x128xf32, #tpu.memory_space<vmem>>, vector<8x128xf32>
    %cst = arith.constant dense<0.000000e+00> : vector<16x128xf32>
    %2 = tpu.matmul %0, %1, %cst {dimension_numbers = #tpu.dot_dimension_numbers<[1], [0], [0], [1], [0, 0, 1, 1], [], []>} : vector<16x8xf32>, vector<8x128xf32>, vector<16x128xf32> -> vector<16x128xf32>
    %c0_3 = arith.constant 0 : index
    %c0_4 = arith.constant 0 : index
    %3 = vector.load %arg3[%c0_3, %c0_4] : memref<1x128xf32, #tpu.memory_space<vmem>>, vector<1x128xf32>
    %4 = vector.broadcast %3 : vector<1x128xf32> to vector<16x128xf32>
    %5 = arith.addf %2, %4 : vector<16x128xf32>
    %c0_5 = arith.constant 0 : index
    %c0_6 = arith.constant 0 : index
    %6 = vector.load %arg2[%c0_5, %c0_6] : memref<32x128xf32, #tpu.memory_space<vmem>>, vector<32x128xf32>
    %cst_7 = arith.constant 0.000000e+00 : f32
    %7 = vector.broadcast %cst_7 : f32 to vector<2x32xf32>
    %cst_8 = arith.constant 0.000000e+00 : f32
    %8 = vector.broadcast %cst_8 : f32 to vector<2x32xf32>
    %9 = vector.extract_strided_slice %5 {offsets = [0, 0], sizes = [2, 128], strides = [1, 1]} : vector<16x128xf32> to vector<2x128xf32>
    %cst_9 = arith.constant dense<0.000000e+00> : vector<2x128xf32>
    %10 = tpu.matmul %7, %6, %cst_9 {dimension_numbers = #tpu.dot_dimension_numbers<[1], [0], [0], [1], [0, 0, 1, 1], [], []>} : vector<2x32xf32>, vector<32x128xf32>, vector<2x128xf32> -> vector<2x128xf32>
    %11 = arith.addf %9, %10 : vector<2x128xf32>
    %12 = vector.extract_strided_slice %11 {offsets = [0, 0], sizes = [2, 96], strides = [1, 1]} : vector<2x128xf32> to vector<2x96xf32>
    %13 = arith.negf %12 : vector<2x96xf32>
    %14 = math.exp %13 : vector<2x96xf32>
    %cst_10 = arith.constant 1.000000e+00 : f32
    %15 = vector.broadcast %cst_10 : f32 to vector<2x96xf32>
    %16 = arith.addf %15, %14 : vector<2x96xf32>
    %17 = arith.divf %15, %16 : vector<2x96xf32>
    %18 = vector.extract_strided_slice %11 {offsets = [0, 96], sizes = [2, 32], strides = [1, 1]} : vector<2x128xf32> to vector<2x32xf32>
    %19 = math.tanh %18 : vector<2x32xf32>
    %20 = vector.extract_strided_slice %17 {offsets = [0, 0], sizes = [2, 32], strides = [1, 1]} : vector<2x96xf32> to vector<2x32xf32>
    %21 = vector.extract_strided_slice %17 {offsets = [0, 32], sizes = [2, 32], strides = [1, 1]} : vector<2x96xf32> to vector<2x32xf32>
    %22 = vector.extract_strided_slice %17 {offsets = [0, 64], sizes = [2, 32], strides = [1, 1]} : vector<2x96xf32> to vector<2x32xf32>
    %23 = arith.mulf %21, %8 : vector<2x32xf32>
    %24 = arith.mulf %20, %19 : vector<2x32xf32>
    %25 = arith.addf %23, %24 : vector<2x32xf32>
    %26 = math.tanh %25 : vector<2x32xf32>
    %27 = arith.mulf %22, %26 : vector<2x32xf32>
    %28 = vector.extract_strided_slice %5 {offsets = [2, 0], sizes = [2, 128], strides = [1, 1]} : vector<16x128xf32> to vector<2x128xf32>
    %cst_11 = arith.constant dense<0.000000e+00> : vector<2x128xf32>
    %29 = tpu.matmul %27, %6, %cst_11 {dimension_numbers = #tpu.dot_dimension_numbers<[1], [0], [0], [1], [0, 0, 1, 1], [], []>} : vector<2x32xf32>, vector<32x128xf32>, vector<2x128xf32> -> vector<2x128xf32>
    %30 = arith.addf %28, %29 : vector<2x128xf32>
    %31 = vector.extract_strided_slice %30 {offsets = [0, 0], sizes = [2, 96], strides = [1, 1]} : vector<2x128xf32> to vector<2x96xf32>
    %32 = arith.negf %31 : vector<2x96xf32>
    %33 = math.exp %32 : vector<2x96xf32>
    %cst_12 = arith.constant 1.000000e+00 : f32
    %34 = vector.broadcast %cst_12 : f32 to vector<2x96xf32>
    %35 = arith.addf %34, %33 : vector<2x96xf32>
    %36 = arith.divf %34, %35 : vector<2x96xf32>
    %37 = vector.extract_strided_slice %30 {offsets = [0, 96], sizes = [2, 32], strides = [1, 1]} : vector<2x128xf32> to vector<2x32xf32>
    %38 = math.tanh %37 : vector<2x32xf32>
    %39 = vector.extract_strided_slice %36 {offsets = [0, 0], sizes = [2, 32], strides = [1, 1]} : vector<2x96xf32> to vector<2x32xf32>
    %40 = vector.extract_strided_slice %36 {offsets = [0, 32], sizes = [2, 32], strides = [1, 1]} : vector<2x96xf32> to vector<2x32xf32>
    %41 = vector.extract_strided_slice %36 {offsets = [0, 64], sizes = [2, 32], strides = [1, 1]} : vector<2x96xf32> to vector<2x32xf32>
    %42 = arith.mulf %40, %25 : vector<2x32xf32>
    %43 = arith.mulf %39, %38 : vector<2x32xf32>
    %44 = arith.addf %42, %43 : vector<2x32xf32>
    %45 = math.tanh %44 : vector<2x32xf32>
    %46 = arith.mulf %41, %45 : vector<2x32xf32>
    %47 = vector.extract_strided_slice %5 {offsets = [4, 0], sizes = [2, 128], strides = [1, 1]} : vector<16x128xf32> to vector<2x128xf32>
    %cst_13 = arith.constant dense<0.000000e+00> : vector<2x128xf32>
    %48 = tpu.matmul %46, %6, %cst_13 {dimension_numbers = #tpu.dot_dimension_numbers<[1], [0], [0], [1], [0, 0, 1, 1], [], []>} : vector<2x32xf32>, vector<32x128xf32>, vector<2x128xf32> -> vector<2x128xf32>
    %49 = arith.addf %47, %48 : vector<2x128xf32>
    %50 = vector.extract_strided_slice %49 {offsets = [0, 0], sizes = [2, 96], strides = [1, 1]} : vector<2x128xf32> to vector<2x96xf32>
    %51 = arith.negf %50 : vector<2x96xf32>
    %52 = math.exp %51 : vector<2x96xf32>
    %cst_14 = arith.constant 1.000000e+00 : f32
    %53 = vector.broadcast %cst_14 : f32 to vector<2x96xf32>
    %54 = arith.addf %53, %52 : vector<2x96xf32>
    %55 = arith.divf %53, %54 : vector<2x96xf32>
    %56 = vector.extract_strided_slice %49 {offsets = [0, 96], sizes = [2, 32], strides = [1, 1]} : vector<2x128xf32> to vector<2x32xf32>
    %57 = math.tanh %56 : vector<2x32xf32>
    %58 = vector.extract_strided_slice %55 {offsets = [0, 0], sizes = [2, 32], strides = [1, 1]} : vector<2x96xf32> to vector<2x32xf32>
    %59 = vector.extract_strided_slice %55 {offsets = [0, 32], sizes = [2, 32], strides = [1, 1]} : vector<2x96xf32> to vector<2x32xf32>
    %60 = vector.extract_strided_slice %55 {offsets = [0, 64], sizes = [2, 32], strides = [1, 1]} : vector<2x96xf32> to vector<2x32xf32>
    %61 = arith.mulf %59, %44 : vector<2x32xf32>
    %62 = arith.mulf %58, %57 : vector<2x32xf32>
    %63 = arith.addf %61, %62 : vector<2x32xf32>
    %64 = math.tanh %63 : vector<2x32xf32>
    %65 = arith.mulf %60, %64 : vector<2x32xf32>
    %66 = vector.extract_strided_slice %5 {offsets = [6, 0], sizes = [2, 128], strides = [1, 1]} : vector<16x128xf32> to vector<2x128xf32>
    %cst_15 = arith.constant dense<0.000000e+00> : vector<2x128xf32>
    %67 = tpu.matmul %65, %6, %cst_15 {dimension_numbers = #tpu.dot_dimension_numbers<[1], [0], [0], [1], [0, 0, 1, 1], [], []>} : vector<2x32xf32>, vector<32x128xf32>, vector<2x128xf32> -> vector<2x128xf32>
    %68 = arith.addf %66, %67 : vector<2x128xf32>
    %69 = vector.extract_strided_slice %68 {offsets = [0, 0], sizes = [2, 96], strides = [1, 1]} : vector<2x128xf32> to vector<2x96xf32>
    %70 = arith.negf %69 : vector<2x96xf32>
    %71 = math.exp %70 : vector<2x96xf32>
    %cst_16 = arith.constant 1.000000e+00 : f32
    %72 = vector.broadcast %cst_16 : f32 to vector<2x96xf32>
    %73 = arith.addf %72, %71 : vector<2x96xf32>
    %74 = arith.divf %72, %73 : vector<2x96xf32>
    %75 = vector.extract_strided_slice %68 {offsets = [0, 96], sizes = [2, 32], strides = [1, 1]} : vector<2x128xf32> to vector<2x32xf32>
    %76 = math.tanh %75 : vector<2x32xf32>
    %77 = vector.extract_strided_slice %74 {offsets = [0, 0], sizes = [2, 32], strides = [1, 1]} : vector<2x96xf32> to vector<2x32xf32>
    %78 = vector.extract_strided_slice %74 {offsets = [0, 32], sizes = [2, 32], strides = [1, 1]} : vector<2x96xf32> to vector<2x32xf32>
    %79 = vector.extract_strided_slice %74 {offsets = [0, 64], sizes = [2, 32], strides = [1, 1]} : vector<2x96xf32> to vector<2x32xf32>
    %80 = arith.mulf %78, %63 : vector<2x32xf32>
    %81 = arith.mulf %77, %76 : vector<2x32xf32>
    %82 = arith.addf %80, %81 : vector<2x32xf32>
    %83 = math.tanh %82 : vector<2x32xf32>
    %84 = arith.mulf %79, %83 : vector<2x32xf32>
    %85 = vector.extract_strided_slice %5 {offsets = [8, 0], sizes = [2, 128], strides = [1, 1]} : vector<16x128xf32> to vector<2x128xf32>
    %cst_17 = arith.constant dense<0.000000e+00> : vector<2x128xf32>
    %86 = tpu.matmul %84, %6, %cst_17 {dimension_numbers = #tpu.dot_dimension_numbers<[1], [0], [0], [1], [0, 0, 1, 1], [], []>} : vector<2x32xf32>, vector<32x128xf32>, vector<2x128xf32> -> vector<2x128xf32>
    %87 = arith.addf %85, %86 : vector<2x128xf32>
    %88 = vector.extract_strided_slice %87 {offsets = [0, 0], sizes = [2, 96], strides = [1, 1]} : vector<2x128xf32> to vector<2x96xf32>
    %89 = arith.negf %88 : vector<2x96xf32>
    %90 = math.exp %89 : vector<2x96xf32>
    %cst_18 = arith.constant 1.000000e+00 : f32
    %91 = vector.broadcast %cst_18 : f32 to vector<2x96xf32>
    %92 = arith.addf %91, %90 : vector<2x96xf32>
    %93 = arith.divf %91, %92 : vector<2x96xf32>
    %94 = vector.extract_strided_slice %87 {offsets = [0, 96], sizes = [2, 32], strides = [1, 1]} : vector<2x128xf32> to vector<2x32xf32>
    %95 = math.tanh %94 : vector<2x32xf32>
    %96 = vector.extract_strided_slice %93 {offsets = [0, 0], sizes = [2, 32], strides = [1, 1]} : vector<2x96xf32> to vector<2x32xf32>
    %97 = vector.extract_strided_slice %93 {offsets = [0, 32], sizes = [2, 32], strides = [1, 1]} : vector<2x96xf32> to vector<2x32xf32>
    %98 = vector.extract_strided_slice %93 {offsets = [0, 64], sizes = [2, 32], strides = [1, 1]} : vector<2x96xf32> to vector<2x32xf32>
    %99 = arith.mulf %97, %82 : vector<2x32xf32>
    %100 = arith.mulf %96, %95 : vector<2x32xf32>
    %101 = arith.addf %99, %100 : vector<2x32xf32>
    %102 = math.tanh %101 : vector<2x32xf32>
    %103 = arith.mulf %98, %102 : vector<2x32xf32>
    %104 = vector.extract_strided_slice %5 {offsets = [10, 0], sizes = [2, 128], strides = [1, 1]} : vector<16x128xf32> to vector<2x128xf32>
    %cst_19 = arith.constant dense<0.000000e+00> : vector<2x128xf32>
    %105 = tpu.matmul %103, %6, %cst_19 {dimension_numbers = #tpu.dot_dimension_numbers<[1], [0], [0], [1], [0, 0, 1, 1], [], []>} : vector<2x32xf32>, vector<32x128xf32>, vector<2x128xf32> -> vector<2x128xf32>
    %106 = arith.addf %104, %105 : vector<2x128xf32>
    %107 = vector.extract_strided_slice %106 {offsets = [0, 0], sizes = [2, 96], strides = [1, 1]} : vector<2x128xf32> to vector<2x96xf32>
    %108 = arith.negf %107 : vector<2x96xf32>
    %109 = math.exp %108 : vector<2x96xf32>
    %cst_20 = arith.constant 1.000000e+00 : f32
    %110 = vector.broadcast %cst_20 : f32 to vector<2x96xf32>
    %111 = arith.addf %110, %109 : vector<2x96xf32>
    %112 = arith.divf %110, %111 : vector<2x96xf32>
    %113 = vector.extract_strided_slice %106 {offsets = [0, 96], sizes = [2, 32], strides = [1, 1]} : vector<2x128xf32> to vector<2x32xf32>
    %114 = math.tanh %113 : vector<2x32xf32>
    %115 = vector.extract_strided_slice %112 {offsets = [0, 0], sizes = [2, 32], strides = [1, 1]} : vector<2x96xf32> to vector<2x32xf32>
    %116 = vector.extract_strided_slice %112 {offsets = [0, 32], sizes = [2, 32], strides = [1, 1]} : vector<2x96xf32> to vector<2x32xf32>
    %117 = vector.extract_strided_slice %112 {offsets = [0, 64], sizes = [2, 32], strides = [1, 1]} : vector<2x96xf32> to vector<2x32xf32>
    %118 = arith.mulf %116, %101 : vector<2x32xf32>
    %119 = arith.mulf %115, %114 : vector<2x32xf32>
    %120 = arith.addf %118, %119 : vector<2x32xf32>
    %121 = math.tanh %120 : vector<2x32xf32>
    %122 = arith.mulf %117, %121 : vector<2x32xf32>
    %123 = vector.extract_strided_slice %5 {offsets = [12, 0], sizes = [2, 128], strides = [1, 1]} : vector<16x128xf32> to vector<2x128xf32>
    %cst_21 = arith.constant dense<0.000000e+00> : vector<2x128xf32>
    %124 = tpu.matmul %122, %6, %cst_21 {dimension_numbers = #tpu.dot_dimension_numbers<[1], [0], [0], [1], [0, 0, 1, 1], [], []>} : vector<2x32xf32>, vector<32x128xf32>, vector<2x128xf32> -> vector<2x128xf32>
    %125 = arith.addf %123, %124 : vector<2x128xf32>
    %126 = vector.extract_strided_slice %125 {offsets = [0, 0], sizes = [2, 96], strides = [1, 1]} : vector<2x128xf32> to vector<2x96xf32>
    %127 = arith.negf %126 : vector<2x96xf32>
    %128 = math.exp %127 : vector<2x96xf32>
    %cst_22 = arith.constant 1.000000e+00 : f32
    %129 = vector.broadcast %cst_22 : f32 to vector<2x96xf32>
    %130 = arith.addf %129, %128 : vector<2x96xf32>
    %131 = arith.divf %129, %130 : vector<2x96xf32>
    %132 = vector.extract_strided_slice %125 {offsets = [0, 96], sizes = [2, 32], strides = [1, 1]} : vector<2x128xf32> to vector<2x32xf32>
    %133 = math.tanh %132 : vector<2x32xf32>
    %134 = vector.extract_strided_slice %131 {offsets = [0, 0], sizes = [2, 32], strides = [1, 1]} : vector<2x96xf32> to vector<2x32xf32>
    %135 = vector.extract_strided_slice %131 {offsets = [0, 32], sizes = [2, 32], strides = [1, 1]} : vector<2x96xf32> to vector<2x32xf32>
    %136 = vector.extract_strided_slice %131 {offsets = [0, 64], sizes = [2, 32], strides = [1, 1]} : vector<2x96xf32> to vector<2x32xf32>
    %137 = arith.mulf %135, %120 : vector<2x32xf32>
    %138 = arith.mulf %134, %133 : vector<2x32xf32>
    %139 = arith.addf %137, %138 : vector<2x32xf32>
    %140 = math.tanh %139 : vector<2x32xf32>
    %141 = arith.mulf %136, %140 : vector<2x32xf32>
    %142 = vector.extract_strided_slice %5 {offsets = [14, 0], sizes = [2, 128], strides = [1, 1]} : vector<16x128xf32> to vector<2x128xf32>
    %cst_23 = arith.constant dense<0.000000e+00> : vector<2x128xf32>
    %143 = tpu.matmul %141, %6, %cst_23 {dimension_numbers = #tpu.dot_dimension_numbers<[1], [0], [0], [1], [0, 0, 1, 1], [], []>} : vector<2x32xf32>, vector<32x128xf32>, vector<2x128xf32> -> vector<2x128xf32>
    %144 = arith.addf %142, %143 : vector<2x128xf32>
    %145 = vector.extract_strided_slice %144 {offsets = [0, 0], sizes = [2, 96], strides = [1, 1]} : vector<2x128xf32> to vector<2x96xf32>
    %146 = arith.negf %145 : vector<2x96xf32>
    %147 = math.exp %146 : vector<2x96xf32>
    %cst_24 = arith.constant 1.000000e+00 : f32
    %148 = vector.broadcast %cst_24 : f32 to vector<2x96xf32>
    %149 = arith.addf %148, %147 : vector<2x96xf32>
    %150 = arith.divf %148, %149 : vector<2x96xf32>
    %151 = vector.extract_strided_slice %144 {offsets = [0, 96], sizes = [2, 32], strides = [1, 1]} : vector<2x128xf32> to vector<2x32xf32>
    %152 = math.tanh %151 : vector<2x32xf32>
    %153 = vector.extract_strided_slice %150 {offsets = [0, 0], sizes = [2, 32], strides = [1, 1]} : vector<2x96xf32> to vector<2x32xf32>
    %154 = vector.extract_strided_slice %150 {offsets = [0, 32], sizes = [2, 32], strides = [1, 1]} : vector<2x96xf32> to vector<2x32xf32>
    %155 = vector.extract_strided_slice %150 {offsets = [0, 64], sizes = [2, 32], strides = [1, 1]} : vector<2x96xf32> to vector<2x32xf32>
    %156 = arith.mulf %154, %139 : vector<2x32xf32>
    %157 = arith.mulf %153, %152 : vector<2x32xf32>
    %158 = arith.addf %156, %157 : vector<2x32xf32>
    %159 = math.tanh %158 : vector<2x32xf32>
    %160 = arith.mulf %155, %159 : vector<2x32xf32>
    %c0_25 = arith.constant 0 : index
    %c0_26 = arith.constant 0 : index
    %161 = vector.load %arg7[%c0_25, %c0_26] : memref<2x32xf32, #tpu.memory_space<vmem>>, vector<2x32xf32>
    tpu.vector_store %arg7[%c0_25, %c0_26], %160 {strides = array<i32>} : memref<2x32xf32, #tpu.memory_space<vmem>>, vector<2x32xf32>,
    %c0_27 = arith.constant 0 : index
    %c0_28 = arith.constant 0 : index
    %162 = vector.load %arg8[%c0_27, %c0_28] : memref<2x32xf32, #tpu.memory_space<vmem>>, vector<2x32xf32>
    tpu.vector_store %arg8[%c0_27, %c0_28], %158 {strides = array<i32>} : memref<2x32xf32, #tpu.memory_space<vmem>>, vector<2x32xf32>,
    %163 = math.tanh %160 : vector<2x32xf32>
    %c0_29 = arith.constant 0 : index
    %c0_30 = arith.constant 0 : index
    %164 = vector.load %arg4[%c0_29, %c0_30] : memref<32x16xf32, #tpu.memory_space<vmem>>, vector<32x16xf32>
    %cst_31 = arith.constant dense<0.000000e+00> : vector<2x16xf32>
    %165 = tpu.matmul %163, %164, %cst_31 {dimension_numbers = #tpu.dot_dimension_numbers<[1], [0], [0], [1], [0, 0, 1, 1], [], []>} : vector<2x32xf32>, vector<32x16xf32>, vector<2x16xf32> -> vector<2x16xf32>
    %c0_32 = arith.constant 0 : index
    %c0_33 = arith.constant 0 : index
    %166 = vector.load %arg5[%c0_32, %c0_33] : memref<1x16xf32, #tpu.memory_space<vmem>>, vector<1x16xf32>
    %167 = vector.broadcast %166 : vector<1x16xf32> to vector<2x16xf32>
    %168 = arith.addf %165, %167 : vector<2x16xf32>
    %c0_34 = arith.constant 0 : index
    %c0_35 = arith.constant 0 : index
    %169 = vector.load %arg6[%c0_34, %c0_35] : memref<2x16xf32, #tpu.memory_space<vmem>>, vector<2x16xf32>
    tpu.vector_store %arg6[%c0_34, %c0_35], %168 {strides = array<i32>} : memref<2x16xf32, #tpu.memory_space<vmem>>, vector<2x16xf32>,
    return
  }
}

</mosaic_0001>

<bundles_post_ra>
// kernel: net_forward.1
= control target key start
LH: loop header
LB: loop body
LE: loop exit
PB: predicated region body
PF: predicated region fallthrough
CT: control target
= control target key end

     0   :  { %14 = vsyncpa [#allocation3], 0  ;;  %vm38_vm0 = vcmask 64512   ;;  %v1480_v3 = vmov 0.0|0.0   ;;  %s1719_s0 = inlined_call_operand.vmem [shape: f32[16,8], index: 0, kind: input, shape index: {}]   ;;  %s1720_s1 = inlined_call_operand.vmem [shape: f32[8,128], index: 1, kind: input, shape index: {}]   ;;  %s1721_s2 = inlined_call_operand.vmem [shape: f32[32,128], index: 2, kind: input, shape index: {}]   ;;  %s1722_s3 = inlined_call_operand.vmem [shape: f32[1,128], index: 3, kind: input, shape index: {}]   ;;  %s1723_s4 = inlined_call_operand.vmem [shape: f32[32,16], index: 4, kind: input, shape index: {}]   ;;  %s1724_s5 = inlined_call_operand.vmem [shape: f32[1,16], index: 5, kind: input, shape index: {}]   ;;  %s1725_s6 = inlined_call_operand.hbm [shape: f32[2,16], index: 6, kind: output, shape index: {0}]   ;;  %s1726_s7 = inlined_call_operand.hbm [shape: f32[2,32], index: 7, kind: output, shape index: {1}]   ;;  %s1727_s8 = inlined_call_operand.hbm [shape: f32[2,32], index: 8, kind: output, shape index: {2}]  }
   0x1   :  { %v120_v0 = vld [vmem:[%s1721_s2] sm:$0xff]  ;;  %v121_v1 = vld [vmem:[%s1721_s2 + $0x8] sm:$0xff]  ;;  %1281 = vmatprep.subr.bf16.mxu1 %v1480_v3  ;;  %v122_v7 = vld [vmem:[%s1721_s2 + $0x10] sm:$0xff] }
   0x2   :  { %v30_v2 = vld [vmem:[%s1720_s1] sm:$0xff]  ;;  %v1544_v4 = vpack.c.bf16 %v121_v1, %v120_v0  ;;  %v29_v6 = vld [vmem:[%s1719_s0 + $0x8] sm:$0xff]  ;;  %v123_v8 = vld [vmem:[%s1721_s2 + $0x18] sm:$0xff] }
   0x3   :  { %1177 = vmatprep.subr.mxu0 %v30_v2  ;;  %v28_v5 = vld [vmem:[%s1719_s0] sm:$0xff] }
   0x4   :  { %1178 = vmatpush3.msra.mxu0 %v30_v2  ;;  %1179 = vmatprep.mubr.msk.f32.mxu0 %vm38_vm0, %v28_v5 }
   0x5   :  { %15 = vsyncpa [#allocation5], 0  ;;  %1283 = vmatpush3.bf16.msra.mxu1 %v1544_v4  ;;  %1180 = vmatmul.mubr.msk.f32.vlgmr.msra.gmra.mrb[0].mxu0 %vm38_vm0, %v29_v6  ;;  %v1559_v9 = vpack.c.bf16 %v123_v8, %v122_v7  ;;  %vm1481_vm1 = vmmov 0   ;;  %v1482_v10 = vmov 0.0   ;;  %v1109_v11 = vld [vmem:[%s1722_s3] ss:$0 sm:$0xff] }
   0x6   :  { %1284 = vmatprep.subr.bf16.mxu1 %v1480_v3  ;;  %1190 = vmatprep.mubr.msk.f32.mxu1 %vm1481_vm1, %v1482_v10  ;;  %s1483_s18 = smov 32   ;;  %s1484_s3 = smov 64   ;;  %vm124_vm2 = vcmask 261120   ;;  %vm971_vm3 = vcmask 261126  }
   0x7   :  { %1287 = vmatprep.subr.bf16.mxu0 %v1480_v3  ;;  %1201 = vmatprep.mubr.msk.f32.mxu0 %vm1481_vm1, %v1482_v10  ;;  %s1485_s27 = smov 96  }
   0x8   :  { %1289 = vmatpush3.bf16.msra.mxu0 %v1544_v4 }
   0x9   :  { %1286 = vmatpush3.bf16.msra.mxu1 %v1559_v9  ;;  %1290 = vmatprep.subr.bf16.mxu0 %v1480_v3 }
   0xa   :  { %1293 = vmatprep.subr.bf16.mxu1 %v1480_v3 }
   0xc   :  { %1191 = vmatmul.mubr.f32.vlgmr.msra.gmra.mrb[0].mxu1 %v1482_v10  ;;  %1292 = vmatpush3.bf16.msra.mxu0 %v1559_v9 }
   0xd   :  { %1295 = vmatpush3.bf16.msra.mxu1 %v1544_v4  ;;  %1212 = vmatprep.mubr.msk.f32.mxu1 %vm1481_vm1, %v1482_v10 }
   0xe   :  { %1296 = vmatprep.subr.bf16.mxu1 %v1480_v3  ;;  %1299 = vmatprep.subr.bf16.mxu0 %v1480_v3 }
  0x11   :  { %1298 = vmatpush3.bf16.msra.mxu1 %v1559_v9 }
  0x12   :  { %1305 = vmatprep.subr.bf16.mxu1 %v1480_v3 }
  0xd8   :  { %v1181_v12 = vpop.f32.mrb[0].mxu0 }
  0xd9   :  { %v1583_v13 = vadd.f32 %v1181_v12, %v1109_v11  ;;  %v111_v14 = vpop.f32.mrb[1].mxu0 }
  0xda   :  { %v1585_v15 = vadd.f32 %v1109_v11, %v111_v14 }
  0xdf   :  { %v194_v16 = vpop.f32.mrb[0].mxu1 }
  0xe0   :  { %v198_v17 = vadd.f32 %v194_v16, %v1585_v15  ;;  %v1192_v18 = vpop.f32.mrb[1].mxu1 }
  0xe2   :  { %1344 = vtanh.f32 %v198_v17  ;;  %v1112_v20 = vmul.f32 -1.442695, %v198_v17 }
  0xe4   :  { %1346 = vpow2.f32 %v1112_v20 }
  0xec   :  { %v1345_v19 = vpop.eup %1344 }
  0xed   :  { %208 = vrot.lane.b32.xlu0 %v1345_v19, %s1483_s18 }
  0xee   :  { %v1347_v21 = vpop.eup %1346 }
  0xef   :  { %v202_v22 = vadd.f32 1.0, %v1347_v21 }
  0xf1   :  { %1348 = vrcp.f32 %v202_v22 }
  0xfb   :  { %v1349_v23 = vpop.eup %1348 }
  0xfc   :  { %v206_v26 = vmul.f32 0.0, %v1349_v23 }
 0x15f   :  { %v209_v24 = vpop.permute.xlu0 %208 }
 0x160   :  { %v211_v25 = vmul.f32 %v1349_v23, %v209_v24 }
 0x162   :  { %213 = vrot.lane.b32.xlu0 %v211_v25, %s1483_s18 }
 0x1d4   :  { %v214_v27 = vpop.permute.xlu0 %213 }
 0x1d5   :  { %v216_v28 = vadd.f32 %v214_v27, %v206_v26 }
 0x1d7   :  { %1350 = vtanh.f32 %v216_v28  ;;  %v310_v44 = vrot.slane %v216_v28, 6 }
 0x1e1   :  { %v1351_v29 = vpop.eup %1350 }
 0x1e2   :  { %219 = vrot.lane.b32.xlu1 %v1351_v29, %s1483_s18 }
 0x254   :  { %v220_v30 = vpop.permute.xlu1 %219 }
 0x255   :  { %v222_v31 = vmul.f32 %v1349_v23, %v220_v30 }
 0x257   :  { %224 = vrot.lane.b32.xlu1 %v222_v31, %s1484_s3 }
 0x2c9   :  { %v225_v32 = vpop.permute.xlu1 %224 }
 0x2ca   :  { %1202 = vmatmul.mubr.msk.f32.vlgmr.msra.gmra.mrb[2].mxu0 %vm124_vm2, %v225_v32 }
 0x2cb   :  { %1301 = vmatpush3.bf16.msra.mxu0 %v1544_v4  ;;  %1223 = vmatprep.mubr.msk.f32.mxu0 %vm1481_vm1, %v1482_v10 }
 0x2cc   :  { %1302 = vmatprep.subr.bf16.mxu0 %v1480_v3 }
 0x2cf   :  { %1304 = vmatpush3.bf16.msra.mxu0 %v1559_v9 }
 0x2d0   :  { %1311 = vmatprep.subr.bf16.mxu0 %v1480_v3 }
 0x39d   :  { %v294_v33 = vpop.f32.mrb[2].mxu0 }
 0x39e   :  { %v299_v34 = vrot.slane %v294_v33, 6  ;;  %v1203_v35 = vpop.f32.mrb[3].mxu0 }
 0x3a0   :  { %v301_v36 = vadd.f32 %v299_v34, %v1585_v15 }
 0x3a2   :  { %1352 = vtanh.f32 %v301_v36  ;;  %v1114_v38 = vmul.f32 -1.442695, %v301_v36 }
 0x3a4   :  { %1354 = vpow2.f32 %v1114_v38 }
 0x3ac   :  { %v1353_v37 = vpop.eup %1352 }
 0x3ad   :  { %314 = vrot.lane.b32.xlu0 %v1353_v37, %s1483_s18 }
 0x3ae   :  { %v1355_v39 = vpop.eup %1354 }
 0x3af   :  { %v305_v40 = vadd.f32 1.0, %v1355_v39 }
 0x3b1   :  { %1356 = vrcp.f32 %v305_v40 }
 0x3bb   :  { %v1357_v41 = vpop.eup %1356 }
 0x3bc   :  { %v312_v45 = vmul.f32 %v1357_v41, %v310_v44 }
 0x41f   :  { %v315_v42 = vpop.permute.xlu0 %314 }
 0x420   :  { %v317_v43 = vmul.f32 %v1357_v41, %v315_v42 }
 0x422   :  { %319 = vrot.lane.b32.xlu1 %v317_v43, %s1483_s18 }
 0x494   :  { %v320_v46 = vpop.permute.xlu1 %319 }
 0x495   :  { %v322_v47 = vadd.f32 %v320_v46, %v312_v45 }
 0x497   :  { %1358 = vtanh.f32 %v322_v47  ;;  %v417_v0 = vrot.slane %v322_v47, 6 }
 0x4a1   :  { %v1359_v48 = vpop.eup %1358 }
 0x4a2   :  { %325 = vrot.lane.b32.xlu0 %v1359_v48, %s1483_s18 }
 0x514   :  { %v326_v49 = vpop.permute.xlu0 %325 }
 0x515   :  { %v328_v50 = vmul.f32 %v1357_v41, %v326_v49 }
 0x517   :  { %v330_v51 = vrot.slane %v328_v50, 2 }
 0x519   :  { %331 = vrot.lane.b32.xlu1 %v330_v51, %s1484_s3 }
 0x58b   :  { %v332_v52 = vpop.permute.xlu1 %331 }
 0x58c   :  { %1213 = vmatmul.mubr.msk.f32.vlgmr.msra.gmra.mrb[2].mxu1 %vm124_vm2, %v332_v52 }
 0x58d   :  { %1307 = vmatpush3.bf16.msra.mxu1 %v1544_v4  ;;  %1234 = vmatprep.mubr.msk.f32.mxu1 %vm1481_vm1, %v1482_v10 }
 0x58e   :  { %1308 = vmatprep.subr.bf16.mxu1 %v1480_v3 }
 0x591   :  { %1310 = vmatpush3.bf16.msra.mxu1 %v1559_v9 }
 0x592   :  { %1317 = vmatprep.subr.bf16.mxu1 %v1480_v3 }
 0x65f   :  { %v401_v53 = vpop.f32.mrb[2].mxu1 }
 0x660   :  { %v406_v54 = vrot.slane %v401_v53, 4  ;;  %v1214_v55 = vpop.f32.mrb[3].mxu1 }
 0x662   :  { %v408_v56 = vadd.f32 %v406_v54, %v1585_v15 }
 0x664   :  { %1360 = vtanh.f32 %v408_v56  ;;  %v1116_v58 = vmul.f32 -1.442695, %v408_v56 }
 0x666   :  { %1362 = vpow2.f32 %v1116_v58 }
 0x66e   :  { %v1361_v57 = vpop.eup %1360 }
 0x66f   :  { %421 = vrot.lane.b32.xlu0 %v1361_v57, %s1483_s18 }
 0x670   :  { %v1363_v59 = vpop.eup %1362 }
 0x671   :  { %v412_v60 = vadd.f32 1.0, %v1363_v59 }
 0x673   :  { %1364 = vrcp.f32 %v412_v60 }
 0x67d   :  { %v1365_v61 = vpop.eup %1364 }
 0x67e   :  { %v419_v1 = vmul.f32 %v1365_v61, %v417_v0 }
 0x6e1   :  { %v422_v62 = vpop.permute.xlu0 %421 }
 0x6e2   :  { %v424_v63 = vmul.f32 %v1365_v61, %v422_v62 }
 0x6e4   :  { %426 = vrot.lane.b32.xlu1 %v424_v63, %s1483_s18 }
 0x756   :  { %v427_v2 = vpop.permute.xlu1 %426 }
 0x757   :  { %v429_v5 = vadd.f32 %v427_v2, %v419_v1 }
 0x759   :  { %1366 = vtanh.f32 %v429_v5  ;;  %v524_v26 = vrot.slane %v429_v5, 6 }
 0x763   :  { %v1367_v6 = vpop.eup %1366 }
 0x764   :  { %432 = vrot.lane.b32.xlu0 %v1367_v6, %s1483_s18 }
 0x7d6   :  { %v433_v7 = vpop.permute.xlu0 %432 }
 0x7d7   :  { %v435_v8 = vmul.f32 %v1365_v61, %v433_v7 }
 0x7d9   :  { %v437_v11 = vrot.slane %v435_v8, 4 }
 0x7db   :  { %438 = vrot.lane.b32.xlu1 %v437_v11, %s1484_s3 }
 0x84d   :  { %v439_v12 = vpop.permute.xlu1 %438 }
 0x84e   :  { %1224 = vmatmul.mubr.msk.f32.vlgmr.msra.gmra.mrb[4].mxu0 %vm124_vm2, %v439_v12 }
 0x84f   :  { %1313 = vmatpush3.bf16.msra.mxu0 %v1544_v4  ;;  %1245 = vmatprep.mubr.msk.f32.mxu0 %vm1481_vm1, %v1482_v10 }
 0x850   :  { %1314 = vmatprep.subr.bf16.mxu0 %v1480_v3 }
 0x853   :  { %1316 = vmatpush3.bf16.msra.mxu0 %v1559_v9 }
 0x854   :  { %1323 = vmatprep.subr.bf16.mxu0 %v1480_v3 }
 0x921   :  { %v508_v14 = vpop.f32.mrb[4].mxu0 }
 0x922   :  { %v513_v16 = vrot.slane %v508_v14, 2  ;;  %v1225_v17 = vpop.f32.mrb[5].mxu0 }
 0x924   :  { %v515_v18 = vadd.f32 %v513_v16, %v1585_v15 }
 0x926   :  { %1368 = vtanh.f32 %v515_v18  ;;  %v1118_v20 = vmul.f32 -1.442695, %v515_v18 }
 0x928   :  { %1370 = vpow2.f32 %v1118_v20 }
 0x930   :  { %v1369_v19 = vpop.eup %1368 }
 0x931   :  { %528 = vrot.lane.b32.xlu0 %v1369_v19, %s1483_s18 }
 0x932   :  { %v1371_v21 = vpop.eup %1370 }
 0x933   :  { %v519_v22 = vadd.f32 1.0, %v1371_v21 }
 0x935   :  { %1372 = vrcp.f32 %v519_v22 }
 0x93f   :  { %v1373_v23 = vpop.eup %1372 }
 0x940   :  { %v526_v27 = vmul.f32 %v1373_v23, %v524_v26 }
 0x9a3   :  { %v529_v24 = vpop.permute.xlu0 %528 }
 0x9a4   :  { %v531_v25 = vmul.f32 %v1373_v23, %v529_v24 }
 0x9a6   :  { %533 = vrot.lane.b32.xlu1 %v531_v25, %s1483_s18 }
 0xa18   :  { %v534_v28 = vpop.permute.xlu1 %533 }
 0xa19   :  { %v536_v29 = vadd.f32 %v534_v28, %v526_v27 }
 0xa1b   :  { %1374 = vtanh.f32 %v536_v29  ;;  %v628_v44 = vrot.slane %v536_v29, 6 }
 0xa25   :  { %v1375_v15 = vpop.eup %1374 }
 0xa26   :  { %539 = vrot.lane.b32.xlu0 %v1375_v15, %s1483_s18 }
 0xa98   :  { %v540_v30 = vpop.permute.xlu0 %539 }
 0xa99   :  { %v542_v31 = vmul.f32 %v1373_v23, %v540_v30 }
 0xa9b   :  { %v544_v32 = vrot.slane %v542_v31, 6 }
 0xa9d   :  { %545 = vrot.lane.b32.xlu1 %v544_v32, %s1484_s3 }
 0xb0f   :  { %v546_v33 = vpop.permute.xlu1 %545 }
 0xb10   :  { %1235 = vmatmul.mubr.msk.f32.vlgmr.msra.gmra.mrb[4].mxu1 %vm124_vm2, %v546_v33 }
 0xb11   :  { %1319 = vmatpush3.bf16.msra.mxu1 %v1544_v4  ;;  %1256 = vmatprep.mubr.msk.f32.mxu1 %vm1481_vm1, %v1482_v10 }
 0xb12   :  { %1320 = vmatprep.subr.bf16.mxu1 %v1480_v3 }
 0xb15   :  { %1322 = vmatpush3.bf16.msra.mxu1 %v1559_v9 }
 0xb16   :  { %1329 = vmatprep.subr.bf16.mxu1 %v1480_v3 }
 0xbe3   :  { %v615_v34 = vpop.f32.mrb[4].mxu1 }
 0xbe4   :  { %v619_v35 = vadd.f32 %v615_v34, %v1583_v13  ;;  %v1236_v36 = vpop.f32.mrb[5].mxu1 }
 0xbe6   :  { %1376 = vtanh.f32 %v619_v35  ;;  %v1120_v38 = vmul.f32 -1.442695, %v619_v35 }
 0xbe8   :  { %1378 = vpow2.f32 %v1120_v38 }
 0xbf0   :  { %v1377_v37 = vpop.eup %1376 }
 0xbf1   :  { %632 = vrot.lane.b32.xlu0 %v1377_v37, %s1483_s18 }
 0xbf2   :  { %v1379_v39 = vpop.eup %1378 }
 0xbf3   :  { %v623_v40 = vadd.f32 1.0, %v1379_v39 }
 0xbf5   :  { %1380 = vrcp.f32 %v623_v40 }
 0xbff   :  { %v1381_v41 = vpop.eup %1380 }
 0xc00   :  { %v630_v45 = vmul.f32 %v1381_v41, %v628_v44 }
 0xc63   :  { %v633_v42 = vpop.permute.xlu0 %632 }
 0xc64   :  { %v635_v43 = vmul.f32 %v1381_v41, %v633_v42 }
 0xc66   :  { %637 = vrot.lane.b32.xlu1 %v635_v43, %s1483_s18 }
 0xcd8   :  { %v638_v46 = vpop.permute.xlu1 %637 }
 0xcd9   :  { %v640_v47 = vadd.f32 %v638_v46, %v630_v45  ;;  %v979_v45 = vld [vmem:[%s1723_s4] sm:$0xff]  ;;  %v980_v46 = vld [vmem:[%s1723_s4 + $0x8] sm:$0xff] }
 0xcdb   :  { %1382 = vtanh.f32 %v640_v47 }
 0xce5   :  { %v1383_v48 = vpop.eup %1382 }
 0xce6   :  { %643 = vrot.lane.b32.xlu0 %v1383_v48, %s1483_s18  ;;  %v1330_v48 = vpack.c.bf16 %v980_v46, %v979_v45 }
 0xd58   :  { %v644_v49 = vpop.permute.xlu0 %643 }
 0xd59   :  { %v646_v50 = vmul.f32 %v1381_v41, %v644_v49  ;;  %v982_v49 = vld [vmem:[%s1723_s4 + $0x18] sm:$0xff] }
 0xd5b   :  { %648 = vrot.lane.b32.xlu1 %v646_v50, %s1484_s3 }
 0xdcd   :  { %v649_v51 = vpop.permute.xlu1 %648 }
 0xdce   :  { %1246 = vmatmul.mubr.msk.f32.vlgmr.msra.gmra.mrb[6].mxu0 %vm124_vm2, %v649_v51 }
 0xdcf   :  { %1325 = vmatpush3.bf16.msra.mxu0 %v1544_v4  ;;  %1267 = vmatprep.mubr.msk.f32.mxu0 %vm1481_vm1, %v1482_v10 }
 0xdd0   :  { %1326 = vmatprep.subr.bf16.mxu0 %v1480_v3 }
 0xdd3   :  { %1328 = vmatpush3.bf16.msra.mxu0 %v1559_v9  ;;  %v734_v9 = vrot.slane %v640_v47, 6  ;;  %v981_v47 = vld [vmem:[%s1723_s4 + $0x10] sm:$0xff]  ;;  %s1486_s4 = smov [#allocation4]  }
 0xdd4   :  { %v1333_v50 = vpack.c.bf16 %v982_v49, %v981_v47  ;;  %s1084_s28 = sshll.u32 %s1486_s4, 4  ;;  %s1085_s28 = int_to_ptr.vmem [resolvable:$true] %s1084_s28 }
 0xdd5   :  { %s1410_s29 = scalar_lea.vmem %s1085_s28, 32  ;;  %p1415_p1 = scmp.lt.s32.totalorder %s1085_s28, %s1085_s28 }
 0xdd6   :  { %p1411_p0 = scmp.ne.s32.totalorder %s1085_s28, %s1410_s29  ;;  %p1416_p2 = scmp.lt.s32.totalorder %s1410_s29, %s1410_s29 }
 0xdd8   :  { %p1417_p3 = por %p1416_p2, %p1415_p1 }
 0xdda   :  { %p1418_p4 = pnand %p1417_p3, %p1411_p0 }
 0xea1   :  { %v718_v52 = vpop.f32.mrb[6].mxu0 }
 0xea2   :  { %v723_v53 = vrot.slane %v718_v52, 6  ;;  %v1247_v54 = vpop.f32.mrb[7].mxu0 }
 0xea4   :  { %v725_v55 = vadd.f32 %v723_v53, %v1583_v13 }
 0xea6   :  { %1384 = vtanh.f32 %v725_v55  ;;  %v1122_v57 = vmul.f32 -1.442695, %v725_v55 }
 0xea8   :  { %1386 = vpow2.f32 %v1122_v57 }
 0xeb0   :  { %v1385_v56 = vpop.eup %1384 }
 0xeb1   :  { %738 = vrot.lane.b32.xlu0 %v1385_v56, %s1483_s18 }
 0xeb2   :  { %v1387_v58 = vpop.eup %1386 }
 0xeb3   :  { %v729_v4 = vadd.f32 1.0, %v1387_v58 }
 0xeb5   :  { %1388 = vrcp.f32 %v729_v4 }
 0xebf   :  { %v1389_v59 = vpop.eup %1388 }
 0xec0   :  { %v736_v62 = vmul.f32 %v1389_v59, %v734_v9 }
 0xf23   :  { %v739_v60 = vpop.permute.xlu0 %738 }
 0xf24   :  { %v741_v61 = vmul.f32 %v1389_v59, %v739_v60 }
 0xf26   :  { %743 = vrot.lane.b32.xlu1 %v741_v61, %s1483_s18 }
 0xf98   :  { %v744_v63 = vpop.permute.xlu1 %743 }
 0xf99   :  { %v746_v0 = vadd.f32 %v744_v63, %v736_v62 }
 0xf9b   :  { %1390 = vtanh.f32 %v746_v0 }
 0xfa5   :  { %v1391_v1 = vpop.eup %1390 }
 0xfa6   :  { %749 = vrot.lane.b32.xlu0 %v1391_v1, %s1483_s18 }
0x1018   :  { %v750_v2 = vpop.permute.xlu0 %749 }
0x1019   :  { %v752_v5 = vmul.f32 %v1389_v59, %v750_v2 }
0x101b   :  { %v754_v6 = vrot.slane %v752_v5, 2 }
0x101d   :  { %755 = vrot.lane.b32.xlu1 %v754_v6, %s1484_s3 }
0x108f   :  { %v756_v7 = vpop.permute.xlu1 %755 }
0x1090   :  { %1257 = vmatmul.mubr.msk.f32.vlgmr.msra.gmra.mrb[6].mxu1 %vm124_vm2, %v756_v7 }
0x1091   :  { %1278 = vmatprep.mubr.msk.f32.mxu1 %vm1481_vm1, %v1482_v10  ;;  %v841_v10 = vrot.slane %v746_v0, 6  ;;  %1331 = vmatpush3.bf16.msra.mxu1 %v1330_v48 }
0x1092   :  { %1332 = vmatprep.subr.bf16.mxu1 %v1480_v3 }
0x1095   :  { %1334 = vmatpush3.bf16.msra.mxu1 %v1333_v50 }
0x1163   :  { %v825_v8 = vpop.f32.mrb[6].mxu1 }
0x1164   :  { %v830_v11 = vrot.slane %v825_v8, 4  ;;  %v1258_v12 = vpop.f32.mrb[7].mxu1 }
0x1166   :  { %v832_v14 = vadd.f32 %v830_v11, %v1583_v13 }
0x1168   :  { %1392 = vtanh.f32 %v832_v14  ;;  %v1124_v17 = vmul.f32 -1.442695, %v832_v14 }
0x116a   :  { %1394 = vpow2.f32 %v1124_v17 }
0x1172   :  { %v1393_v16 = vpop.eup %1392 }
0x1173   :  { %845 = vrot.lane.b32.xlu0 %v1393_v16, %s1483_s18 }
0x1174   :  { %v1395_v18 = vpop.eup %1394 }
0x1175   :  { %v836_v19 = vadd.f32 1.0, %v1395_v18 }
0x1177   :  { %1396 = vrcp.f32 %v836_v19 }
0x1181   :  { %v1397_v20 = vpop.eup %1396 }
0x1182   :  { %v843_v23 = vmul.f32 %v1397_v20, %v841_v10 }
0x11e5   :  { %v846_v21 = vpop.permute.xlu0 %845 }
0x11e6   :  { %v848_v22 = vmul.f32 %v1397_v20, %v846_v21 }
0x11e8   :  { %850 = vrot.lane.b32.xlu1 %v848_v22, %s1483_s18 }
0x125a   :  { %v851_v24 = vpop.permute.xlu1 %850 }
0x125b   :  { %v853_v25 = vadd.f32 %v851_v24, %v843_v23 }
0x125d   :  { %1398 = vtanh.f32 %v853_v25  ;;  %v948_v41 = vrot.slane %v853_v25, 6 }
0x1267   :  { %v1399_v26 = vpop.eup %1398 }
0x1268   :  { %856 = vrot.lane.b32.xlu0 %v1399_v26, %s1483_s18 }
0x12da   :  { %v857_v27 = vpop.permute.xlu0 %856 }
0x12db   :  { %v859_v28 = vmul.f32 %v1397_v20, %v857_v27 }
0x12dd   :  { %v861_v29 = vrot.slane %v859_v28, 4 }
0x12df   :  { %862 = vrot.lane.b32.xlu1 %v861_v29, %s1484_s3 }
0x1351   :  { %v863_v15 = vpop.permute.xlu1 %862 }
0x1352   :  { %1268 = vmatmul.mubr.msk.f32.vlgmr.msra.gmra.mrb[8].mxu0 %vm124_vm2, %v863_v15 }
0x1425   :  { %v932_v30 = vpop.f32.mrb[8].mxu0 }
0x1426   :  { %v937_v31 = vrot.slane %v932_v30, 2  ;;  %v1269_v32 = vpop.f32.mrb[9].mxu0 }
0x1428   :  { %v939_v33 = vadd.f32 %v937_v31, %v1583_v13 }
0x142a   :  { %1400 = vtanh.f32 %v939_v33  ;;  %v1126_v35 = vmul.f32 -1.442695, %v939_v33 }
0x142c   :  { %1402 = vpow2.f32 %v1126_v35 }
0x1434   :  { %v1401_v34 = vpop.eup %1400 }
0x1435   :  { %952 = vrot.lane.b32.xlu0 %v1401_v34, %s1483_s18 }
0x1436   :  { %v1403_v36 = vpop.eup %1402 }
0x1437   :  { %v943_v37 = vadd.f32 1.0, %v1403_v36 }
0x1439   :  { %1404 = vrcp.f32 %v943_v37 }
0x1443   :  { %v1405_v38 = vpop.eup %1404 }
0x1444   :  { %v950_v42 = vmul.f32 %v1405_v38, %v948_v41 }
0x14a7   :  { %v953_v39 = vpop.permute.xlu0 %952 }
0x14a8   :  { %v955_v40 = vmul.f32 %v1405_v38, %v953_v39 }
0x14aa   :  { %957 = vrot.lane.b32.xlu1 %v955_v40, %s1483_s18 }
0x151c   :  { %v958_v43 = vpop.permute.xlu1 %957 }
0x151d   :  { %v960_v44 = vadd.f32 %v958_v43, %v950_v42 }
0x151f   :  { %1406 = vtanh.f32 %v960_v44 }
0x1529   :  { %v1407_v13 = vpop.eup %1406 }
0x152a   :  { %963 = vrot.lane.b32.xlu0 %v1407_v13, %s1483_s18 }
0x159c   :  { %v964_v51 = vpop.permute.xlu0 %963 }
0x159d   :  { %v966_v52 = vmul.f32 %v1405_v38, %v964_v51 }
0x159f   :  { %1408 = vtanh.f32 %v966_v52  ;;  %968 = vrot.lane.b32.xlu0 %v966_v52, %s1484_s3 }
0x15a9   :  { %v1409_v53 = vpop.eup %1408 }
0x15aa   :  { %v991_v54 = vrot.slane %v1409_v53, 6 }
0x15ac   :  { %992 = vrot.lane.b32.xlu1 %v991_v54, %s1484_s3 }
0x15b0   :  { %974 = vrot.lane.b32.xlu1 %v960_v44, %s1485_s27 }
0x1611   :  { %v969_v55 = vpop.permute.xlu0 %968 }
0x1612   :  { %972 = vst.msk [vmem:[#allocation4 - $0x6] sm:$0xc0] %vm971_vm3, %v969_v55 }
0x161e   :  { %v993_v56 = vpop.permute.xlu1 %992 }
0x161f   :  { %1279 = vmatmul.mubr.msk.f32.vlgmr.msra.gmra.mrb[8].mxu1 %vm124_vm2, %v993_v56 }
0x1622   :  { %v975_v57 = vpop.permute.xlu1 %974 }
0x1623   :  { %977 = vst.msk [vmem:[#allocation6 - $0x6] sm:$0xc0] %vm971_vm3, %v975_v57 }
0x1624   :  { %1421 = shalt.err (!%p1418_p4)
}
0x1625   :  { %s1422_s10 = scalar_lea.hbm %s1726_s7, 32 }
0x1626   :  { %p1423_p5 = scmp.ne.s32.totalorder %s1726_s7, %s1422_s10  ;;  %p1426_p6 = scmp.lt.u32.totalorder %s1422_s10, %s1726_s7 }
0x1628   :  { %p1428_p7 = pnand %p1426_p6, %p1423_p5 }
0x162a   :  { %1431 = shalt.err (!%p1428_p7)
}
0x162b   :  { %1087 = dma.vmem_to_hbm [thread:$0]  %s1085_s28, 32, %s1726_s7, [#allocation5]  }
0x162c   :  { %s1487_s1 = smov [#allocation6]  }
0x162d   :  { %s1094_s17 = sshll.u32 %s1487_s1, 4  ;;  %s1095_s17 = int_to_ptr.vmem [resolvable:$true] %s1094_s17 }
0x162e   :  { %s1432_s0 = scalar_lea.vmem %s1095_s17, 32  ;;  %p1437_p9 = scmp.lt.s32.totalorder %s1095_s17, %s1095_s17 }
0x162f   :  { %p1433_p8 = scmp.ne.s32.totalorder %s1095_s17, %s1432_s0  ;;  %p1438_p10 = scmp.lt.s32.totalorder %s1432_s0, %s1432_s0 }
0x1631   :  { %p1439_p11 = por %p1438_p10, %p1437_p9 }
0x1633   :  { %p1440_p12 = pnand %p1439_p11, %p1433_p8 }
0x1635   :  { %1443 = shalt.err (!%p1440_p12)
}
0x1636   :  { %s1444_s3 = scalar_lea.hbm %s1727_s8, 32 }
0x1637   :  { %p1445_p13 = scmp.ne.s32.totalorder %s1727_s8, %s1444_s3  ;;  %p1448_p0 = scmp.lt.u32.totalorder %s1444_s3, %s1727_s8 }
0x1639   :  { %p1450_p1 = pnand %p1448_p0, %p1445_p13 }
0x163b   :  { %1453 = shalt.err (!%p1450_p1)
}
0x163c   :  { %1097 = dma.vmem_to_hbm [thread:$0]  %s1095_s17, 32, %s1727_s8, [#allocation5]   ;;  %v1127_v3 = vld [vmem:[%s1724_s5] ss:$0 sm:$0xff]  ;;  %vm1066_vm4 = vcmask 123904  }
0x163d   :  { %s1488_s26 = smov [#allocation2]  }
0x163e   :  { %s1074_s27 = sshll.u32 %s1488_s26, 4  ;;  %s1075_s27 = int_to_ptr.vmem [resolvable:$true] %s1074_s27 }
0x163f   :  { %s1454_s4 = scalar_lea.vmem %s1075_s27, 32  ;;  %p1459_p3 = scmp.lt.s32.totalorder %s1075_s27, %s1075_s27 }
0x1640   :  { %p1455_p2 = scmp.ne.s32.totalorder %s1075_s27, %s1454_s4  ;;  %p1460_p4 = scmp.lt.s32.totalorder %s1454_s4, %s1454_s4 }
0x1642   :  { %p1461_p5 = por %p1460_p4, %p1459_p3 }
0x1644   :  { %p1462_p6 = pnand %p1461_p5, %p1455_p2 }
0x16f2   :  { %v1062_v58 = vpop.f32.mrb[8].mxu1 }
0x16f3   :  { %v1063_v4 = vadd.f32 %v1127_v3, %v1062_v58  ;;  %v1280_v59 = vpop.f32.mrb[9].mxu1 }
0x16f5   :  { %1067 = vst.msk [vmem:[#allocation2] sm:$0x3] %vm1066_vm4, %v1063_v4 }
0x16f6   :  { %1465 = shalt.err (!%p1462_p6)
}
0x16f7   :  { %s1466_s29 = scalar_lea.hbm %s1725_s6, 32 }
0x16f8   :  { %p1467_p7 = scmp.ne.s32.totalorder %s1725_s6, %s1466_s29  ;;  %p1470_p8 = scmp.lt.u32.totalorder %s1466_s29, %s1725_s6 }
0x16fa   :  { %p1472_p9 = pnand %p1470_p8, %p1467_p7 }
0x16fc   :  { %1475 = shalt.err (!%p1472_p9)
}
0x16fd   :  { %1077 = dma.vmem_to_hbm [thread:$0]  %s1075_s27, 32, %s1725_s6, [#allocation3]  }
0x16fe   :  { %1476 = dma.done.wait [#allocation3], 32  }
0x16ff   :  { %1477 = vsyncadd [#allocation3], 4294967264 }
0x1700   :  { %1478 = dma.done.wait [#allocation5], 64  }
0x1701   :  { %1479 = vsyncadd [#allocation5], 4294967232 }
0x1702   :  { %1107 = vsyncpa [#allocation3], 1 }
0x1703   :  { %1108 = vsyncpa [#allocation5], 1 }

</bundles_post_ra>
